<compile_context>
chip_gen: v7x
topology: tpu7x:2x2x1
jax: 0.10.0
libtpu: 0.0.40
codegen_flags: <defaults>
</compile_context>

<pallas_src>
import jax
import jax.numpy as jnp
from jax.experimental import pallas as pl
from jax.experimental.pallas import tpu as pltpu


def _round_up(n, m):
    return ((n + m - 1) // m) * m


def _mlp_critic_kernel(x_ref, att_ref, w1a_ref, w1b_ref, b1_ref,
                       w2_ref, b2_ref, w3_ref, b3_ref, w4_ref, b4_ref,
                       out_ref):
    """One batch tile of the critic MLP (weights VMEM-resident across the grid)."""

    def lrelu(v):
        # LeakyReLU(0.2): plain VPU select, stays in f32.
        return jnp.where(v >= 0.0, v, 0.2 * v)

    bf16 = jnp.bfloat16

    # fc1: two MXU calls accumulating into the same f32 result (no concat).
    h = (jnp.dot(x_ref[...].astype(bf16), w1a_ref[...],
                 preferred_element_type=jnp.float32)
         + jnp.dot(att_ref[...].astype(bf16), w1b_ref[...],
                   preferred_element_type=jnp.float32)
         + b1_ref[...])
    h = lrelu(h)

    # fc2 + LeakyReLU(0.2)
    h = lrelu(jnp.dot(h.astype(bf16), w2_ref[...],
                      preferred_element_type=jnp.float32) + b2_ref[...])
    # fc3 + LeakyReLU(0.2)
    h = lrelu(jnp.dot(h.astype(bf16), w3_ref[...],
                      preferred_element_type=jnp.float32) + b3_ref[...])
    # fc4 (output padded to 128 lanes; real result is column 0)
    out = jnp.dot(h.astype(bf16), w4_ref[...],
                  preferred_element_type=jnp.float32) + b4_ref[...]
    out_ref[...] = out.astype(out_ref.dtype)


def mlp_3hl_critic(x, att, params, *, block_b=256):
    """x: [B, resSize], att: [B, attSize]; returns [B, 1] (float32)."""
    w1, b1, w2, b2, w3, b3, w4, b4 = params
    B, res = x.shape
    att_dim = att.shape[1]
    ndh = w1.shape[1]

    # Lane-aligned internal widths (zero padding is semantics-preserving:
    # padded hidden columns are 0 and LeakyReLU(0) = 0).
    ndh_p = _round_up(ndh, 128)
    out_pad = 128  # lane-dense fc4 output width

    # Batch tile: multiple of 8 sublanes, capped at block_b; pad B to a multiple.
    tb = min(block_b, _round_up(B, 8))
    b_pad = _round_up(B, tb)
    if b_pad != B:
        x = jnp.pad(x, ((0, b_pad - B), (0, 0)))
        att = jnp.pad(att, ((0, b_pad - B), (0, 0)))
    x = x.astype(jnp.float32)
    att = att.astype(jnp.float32)

    bf16 = jnp.bfloat16
    dh = ndh_p - ndh

    # Split fc1 weight along its input axis (kills the in-kernel concat) and
    # pad all hidden-width axes to ndh_p; pad fc4 output to 128 lanes.
    w1a = jnp.pad(w1[:res], ((0, 0), (0, dh))).astype(bf16)
    w1b = jnp.pad(w1[res:], ((0, 0), (0, dh))).astype(bf16)
    w2p = jnp.pad(w2, ((0, dh), (0, dh))).astype(bf16)
    w3p = jnp.pad(w3, ((0, dh), (0, dh))).astype(bf16)
    w4p = jnp.pad(w4, ((0, dh), (0, out_pad - w4.shape[1]))).astype(bf16)
    b1p = jnp.pad(b1, ((0, 0), (0, dh))).astype(jnp.float32)
    b2p = jnp.pad(b2, ((0, 0), (0, dh))).astype(jnp.float32)
    b3p = jnp.pad(b3, ((0, 0), (0, dh))).astype(jnp.float32)
    b4p = jnp.pad(b4, ((0, 0), (0, out_pad - b4.shape[1]))).astype(jnp.float32)

    n_tiles = b_pad // tb

    def act_spec(feat):
        return pl.BlockSpec((tb, feat), lambda i: (i, 0))

    def resident_spec(a):
        # Same block for every grid step -> stays VMEM-resident, DMA'd once.
        return pl.BlockSpec(a.shape, lambda i: (0, 0))

    weight_arrs = (w1a, w1b, w2p, w3p, w4p, b1p, b2p, b3p, b4p)
    weight_bytes = sum(int(a.size) * a.dtype.itemsize for a in weight_arrs)
    tile_bytes = tb * (res + att_dim + out_pad) * 4
    flops = 2 * b_pad * (res * ndh_p + att_dim * ndh_p
                         + 2 * ndh_p * ndh_p + ndh_p * out_pad)
    bytes_accessed = (weight_bytes
                      + b_pad * (res + att_dim) * 4   # activations in (f32)
                      + b_pad * out_pad * 4)          # output (f32)

    # Resident weights + double-buffered activation tiles, with headroom;
    # conservative so it is accepted on every generation (v5e/v6e/v7x).
    vmem_budget = max(32 * 1024 * 1024,
                      min(64 * 1024 * 1024, 4 * (weight_bytes + tile_bytes)))

    out = pl.pallas_call(
        _mlp_critic_kernel,
        out_shape=jax.ShapeDtypeStruct((b_pad, out_pad), jnp.float32),
        grid=(n_tiles,),
        in_specs=[act_spec(res), act_spec(att_dim),
                  resident_spec(w1a), resident_spec(w1b), resident_spec(b1p),
                  resident_spec(w2p), resident_spec(b2p),
                  resident_spec(w3p), resident_spec(b3p),
                  resident_spec(w4p), resident_spec(b4p)],
        out_specs=pl.BlockSpec((tb, out_pad), lambda i: (i, 0)),
        compiler_params=pltpu.CompilerParams(
            dimension_semantics=("parallel",),
            vmem_limit_bytes=int(vmem_budget)),
        cost_estimate=pl.CostEstimate(flops=flops, transcendentals=0,
                                      bytes_accessed=int(bytes_accessed)),
    )(x, att, w1a, w1b, b1p, w2p, b2p, w3p, b3p, w4p, b4p)

    return out[:B, :1]


def init_params(key, res_size, att_size, ndh):
    """Deterministic init matching weights_init: W ~ N(0, 0.02), b = 0.

    Weights stored as [in, out] (transposed vs. nn.Linear's [out, in])."""
    ks = jax.random.split(key, 4)

    def lin(k, fan_in, fan_out):
        w = 0.02 * jax.random.normal(k, (fan_in, fan_out), dtype=jnp.float32)
        b = jnp.zeros((1, fan_out), dtype=jnp.float32)
        return w, b

    w1, b1 = lin(ks[0], res_size + att_size, ndh)
    w2, b2 = lin(ks[1], ndh, ndh)
    w3, b3 = lin(ks[2], ndh, ndh)
    w4, b4 = lin(ks[3], ndh, 1)
    return (w1, b1, w2, b2, w3, b3, w4, b4)


def _reference(x, att, params):
    """Pure-JAX reference mirroring the kernel's bf16 matmul / f32 accumulate."""
    w1, b1, w2, b2, w3, b3, w4, b4 = params
    bf = lambda a: a.astype(jnp.bfloat16)
    lrelu = lambda v: jnp.where(v >= 0, v, 0.2 * v)
    h = jnp.concatenate([x, att], axis=1)
    h = lrelu(jnp.dot(bf(h), bf(w1), preferred_element_type=jnp.float32) + b1)
    h = lrelu(jnp.dot(bf(h), bf(w2), preferred_element_type=jnp.float32) + b2)
    h = lrelu(jnp.dot(bf(h), bf(w3), preferred_element_type=jnp.float32) + b3)
    return jnp.dot(bf(h), bf(w4), preferred_element_type=jnp.float32) + b4


if __name__ == "__main__":
    # Small synthetic shapes implied by the module: opt.resSize, opt.attSize, opt.ndh
    B, RES, ATT, NDH = 8, 32, 16, 32
    key = jax.random.PRNGKey(0)
    kx, ka, kp = jax.random.split(key, 3)
    x = jax.random.normal(kx, (B, RES), dtype=jnp.float32)
    att = jax.random.normal(ka, (B, ATT), dtype=jnp.float32)
    params = init_params(kp, RES, ATT, NDH)

    out = mlp_3hl_critic(x, att, params)
    out = jax.block_until_ready(out)

    ref = _reference(x, att, params)
    assert out.shape == (B, 1), out.shape
    # bf16 weight/activation path -> tolerance loosened vs. pure f32.
    assert jnp.allclose(out, ref, atol=2e-2, rtol=2e-2), (
        jnp.max(jnp.abs(out - ref)))
    print("KERNEL_OK")
</pallas_src>

<mosaic_0001>
module attributes {stable_mosaic.version = 11 : i64} {
  func.func @_mlp_critic_kernel(%arg0: i32, %arg1: memref<8x32xf32, #tpu.memory_space<vmem>>, %arg2: memref<8x16xf32, #tpu.memory_space<vmem>>, %arg3: memref<32x128xbf16, #tpu.memory_space<vmem>>, %arg4: memref<16x128xbf16, #tpu.memory_space<vmem>>, %arg5: memref<1x128xf32, #tpu.memory_space<vmem>>, %arg6: memref<128x128xbf16, #tpu.memory_space<vmem>>, %arg7: memref<1x128xf32, #tpu.memory_space<vmem>>, %arg8: memref<128x128xbf16, #tpu.memory_space<vmem>>, %arg9: memref<1x128xf32, #tpu.memory_space<vmem>>, %arg10: memref<128x128xbf16, #tpu.memory_space<vmem>>, %arg11: memref<1x128xf32, #tpu.memory_space<vmem>>, %arg12: memref<8x128xf32, #tpu.memory_space<vmem>>) attributes {dimension_semantics = [#tpu.dimension_semantics<parallel>], iteration_bounds = array<i64: 1>, scalar_prefetch = 0 : i64, scratch_operands = 0 : i64, tpu.core_type = #tpu.core_type<tc>, window_params = [{transform_indices = @transform_0, window_bounds = array<i64: 8, 32>}, {transform_indices = @transform_1, window_bounds = array<i64: 8, 16>}, {pipeline_mode = #tpu.pipeline_mode<synchronous>, transform_indices = @transform_2, window_bounds = array<i64: 32, 128>}, {pipeline_mode = #tpu.pipeline_mode<synchronous>, transform_indices = @transform_3, window_bounds = array<i64: 16, 128>}, {pipeline_mode = #tpu.pipeline_mode<synchronous>, transform_indices = @transform_4, window_bounds = array<i64: 1, 128>}, {pipeline_mode = #tpu.pipeline_mode<synchronous>, transform_indices = @transform_5, window_bounds = array<i64: 128, 128>}, {pipeline_mode = #tpu.pipeline_mode<synchronous>, transform_indices = @transform_6, window_bounds = array<i64: 1, 128>}, {pipeline_mode = #tpu.pipeline_mode<synchronous>, transform_indices = @transform_7, window_bounds = array<i64: 128, 128>}, {pipeline_mode = #tpu.pipeline_mode<synchronous>, transform_indices = @transform_8, window_bounds = array<i64: 1, 128>}, {pipeline_mode = #tpu.pipeline_mode<synchronous>, transform_indices = @transform_9, window_bounds = array<i64: 128, 128>}, {pipeline_mode = #tpu.pipeline_mode<synchronous>, transform_indices = @transform_10, window_bounds = array<i64: 1, 128>}, {transform_indices = @transform_11, window_bounds = array<i64: 8, 128>}]} {
    %c0 = arith.constant 0 : index
    %c0_0 = arith.constant 0 : index
    %0 = vector.load %arg1[%c0, %c0_0] : memref<8x32xf32, #tpu.memory_space<vmem>>, vector<8x32xf32>
    %1 = arith.truncf %0 : vector<8x32xf32> to vector<8x32xbf16>
    %c0_1 = arith.constant 0 : index
    %c0_2 = arith.constant 0 : index
    %2 = vector.load %arg3[%c0_1, %c0_2] : memref<32x128xbf16, #tpu.memory_space<vmem>>, vector<32x128xbf16>
    %cst = arith.constant dense<0.000000e+00> : vector<8x128xf32>
    %3 = tpu.matmul %1, %2, %cst {dimension_numbers = #tpu.dot_dimension_numbers<[1], [0], [0], [1], [0, 0, 1, 1], [], []>} : vector<8x32xbf16>, vector<32x128xbf16>, vector<8x128xf32> -> vector<8x128xf32>
    %c0_3 = arith.constant 0 : index
    %c0_4 = arith.constant 0 : index
    %4 = vector.load %arg2[%c0_3, %c0_4] : memref<8x16xf32, #tpu.memory_space<vmem>>, vector<8x16xf32>
    %5 = arith.truncf %4 : vector<8x16xf32> to vector<8x16xbf16>
    %c0_5 = arith.constant 0 : index
    %c0_6 = arith.constant 0 : index
    %6 = vector.load %arg4[%c0_5, %c0_6] : memref<16x128xbf16, #tpu.memory_space<vmem>>, vector<16x128xbf16>
    %cst_7 = arith.constant dense<0.000000e+00> : vector<8x128xf32>
    %7 = tpu.matmul %5, %6, %cst_7 {dimension_numbers = #tpu.dot_dimension_numbers<[1], [0], [0], [1], [0, 0, 1, 1], [], []>} : vector<8x16xbf16>, vector<16x128xbf16>, vector<8x128xf32> -> vector<8x128xf32>
    %8 = arith.addf %3, %7 : vector<8x128xf32>
    %c0_8 = arith.constant 0 : index
    %c0_9 = arith.constant 0 : index
    %9 = vector.load %arg5[%c0_8, %c0_9] : memref<1x128xf32, #tpu.memory_space<vmem>>, vector<1x128xf32>
    %10 = vector.broadcast %9 : vector<1x128xf32> to vector<8x128xf32>
    %11 = arith.addf %8, %10 : vector<8x128xf32>
    %cst_10 = arith.constant 0.000000e+00 : f32
    %12 = vector.broadcast %cst_10 : f32 to vector<8x128xf32>
    %13 = arith.cmpf oge, %11, %12 : vector<8x128xf32>
    %cst_11 = arith.constant 2.000000e-01 : f32
    %14 = vector.broadcast %cst_11 : f32 to vector<8x128xf32>
    %15 = arith.mulf %14, %11 : vector<8x128xf32>
    %16 = arith.select %13, %11, %15 : vector<8x128xi1>, vector<8x128xf32>
    %17 = arith.truncf %16 : vector<8x128xf32> to vector<8x128xbf16>
    %c0_12 = arith.constant 0 : index
    %c0_13 = arith.constant 0 : index
    %18 = vector.load %arg6[%c0_12, %c0_13] : memref<128x128xbf16, #tpu.memory_space<vmem>>, vector<128x128xbf16>
    %cst_14 = arith.constant dense<0.000000e+00> : vector<8x128xf32>
    %19 = tpu.matmul %17, %18, %cst_14 {dimension_numbers = #tpu.dot_dimension_numbers<[1], [0], [0], [1], [0, 0, 1, 1], [], []>} : vector<8x128xbf16>, vector<128x128xbf16>, vector<8x128xf32> -> vector<8x128xf32>
    %c0_15 = arith.constant 0 : index
    %c0_16 = arith.constant 0 : index
    %20 = vector.load %arg7[%c0_15, %c0_16] : memref<1x128xf32, #tpu.memory_space<vmem>>, vector<1x128xf32>
    %21 = vector.broadcast %20 : vector<1x128xf32> to vector<8x128xf32>
    %22 = arith.addf %19, %21 : vector<8x128xf32>
    %cst_17 = arith.constant 0.000000e+00 : f32
    %23 = vector.broadcast %cst_17 : f32 to vector<8x128xf32>
    %24 = arith.cmpf oge, %22, %23 : vector<8x128xf32>
    %cst_18 = arith.constant 2.000000e-01 : f32
    %25 = vector.broadcast %cst_18 : f32 to vector<8x128xf32>
    %26 = arith.mulf %25, %22 : vector<8x128xf32>
    %27 = arith.select %24, %22, %26 : vector<8x128xi1>, vector<8x128xf32>
    %28 = arith.truncf %27 : vector<8x128xf32> to vector<8x128xbf16>
    %c0_19 = arith.constant 0 : index
    %c0_20 = arith.constant 0 : index
    %29 = vector.load %arg8[%c0_19, %c0_20] : memref<128x128xbf16, #tpu.memory_space<vmem>>, vector<128x128xbf16>
    %cst_21 = arith.constant dense<0.000000e+00> : vector<8x128xf32>
    %30 = tpu.matmul %28, %29, %cst_21 {dimension_numbers = #tpu.dot_dimension_numbers<[1], [0], [0], [1], [0, 0, 1, 1], [], []>} : vector<8x128xbf16>, vector<128x128xbf16>, vector<8x128xf32> -> vector<8x128xf32>
    %c0_22 = arith.constant 0 : index
    %c0_23 = arith.constant 0 : index
    %31 = vector.load %arg9[%c0_22, %c0_23] : memref<1x128xf32, #tpu.memory_space<vmem>>, vector<1x128xf32>
    %32 = vector.broadcast %31 : vector<1x128xf32> to vector<8x128xf32>
    %33 = arith.addf %30, %32 : vector<8x128xf32>
    %cst_24 = arith.constant 0.000000e+00 : f32
    %34 = vector.broadcast %cst_24 : f32 to vector<8x128xf32>
    %35 = arith.cmpf oge, %33, %34 : vector<8x128xf32>
    %cst_25 = arith.constant 2.000000e-01 : f32
    %36 = vector.broadcast %cst_25 : f32 to vector<8x128xf32>
    %37 = arith.mulf %36, %33 : vector<8x128xf32>
    %38 = arith.select %35, %33, %37 : vector<8x128xi1>, vector<8x128xf32>
    %39 = arith.truncf %38 : vector<8x128xf32> to vector<8x128xbf16>
    %c0_26 = arith.constant 0 : index
    %c0_27 = arith.constant 0 : index
    %40 = vector.load %arg10[%c0_26, %c0_27] : memref<128x128xbf16, #tpu.memory_space<vmem>>, vector<128x128xbf16>
    %cst_28 = arith.constant dense<0.000000e+00> : vector<8x128xf32>
    %41 = tpu.matmul %39, %40, %cst_28 {dimension_numbers = #tpu.dot_dimension_numbers<[1], [0], [0], [1], [0, 0, 1, 1], [], []>} : vector<8x128xbf16>, vector<128x128xbf16>, vector<8x128xf32> -> vector<8x128xf32>
    %c0_29 = arith.constant 0 : index
    %c0_30 = arith.constant 0 : index
    %42 = vector.load %arg11[%c0_29, %c0_30] : memref<1x128xf32, #tpu.memory_space<vmem>>, vector<1x128xf32>
    %43 = vector.broadcast %42 : vector<1x128xf32> to vector<8x128xf32>
    %44 = arith.addf %41, %43 : vector<8x128xf32>
    %c0_31 = arith.constant 0 : index
    %c0_32 = arith.constant 0 : index
    %45 = vector.load %arg12[%c0_31, %c0_32] : memref<8x128xf32, #tpu.memory_space<vmem>>, vector<8x128xf32>
    tpu.vector_store %arg12[%c0_31, %c0_32], %44 {strides = array<i32>} : memref<8x128xf32, #tpu.memory_space<vmem>>, vector<8x128xf32>,
    return
  }
  func.func @transform_0(%arg0: i32) -> (i32, i32) {
    %c0_i32 = arith.constant 0 : i32
    %c0_i32_0 = arith.constant 0 : i32
    return %arg0, %c0_i32 : i32, i32
  }
  func.func @transform_1(%arg0: i32) -> (i32, i32) {
    %c0_i32 = arith.constant 0 : i32
    %c0_i32_0 = arith.constant 0 : i32
    return %arg0, %c0_i32 : i32, i32
  }
  func.func @transform_2(%arg0: i32) -> (i32, i32) {
    %c0_i32 = arith.constant 0 : i32
    %c0_i32_0 = arith.constant 0 : i32
    %c0_i32_1 = arith.constant 0 : i32
    return %c0_i32, %c0_i32_0 : i32, i32
  }
  func.func @transform_3(%arg0: i32) -> (i32, i32) {
    %c0_i32 = arith.constant 0 : i32
    %c0_i32_0 = arith.constant 0 : i32
    %c0_i32_1 = arith.constant 0 : i32
    return %c0_i32, %c0_i32_0 : i32, i32
  }
  func.func @transform_4(%arg0: i32) -> (i32, i32) {
    %c0_i32 = arith.constant 0 : i32
    %c0_i32_0 = arith.constant 0 : i32
    %c0_i32_1 = arith.constant 0 : i32
    return %c0_i32, %c0_i32_0 : i32, i32
  }
  func.func @transform_5(%arg0: i32) -> (i32, i32) {
    %c0_i32 = arith.constant 0 : i32
    %c0_i32_0 = arith.constant 0 : i32
    %c0_i32_1 = arith.constant 0 : i32
    return %c0_i32, %c0_i32_0 : i32, i32
  }
  func.func @transform_6(%arg0: i32) -> (i32, i32) {
    %c0_i32 = arith.constant 0 : i32
    %c0_i32_0 = arith.constant 0 : i32
    %c0_i32_1 = arith.constant 0 : i32
    return %c0_i32, %c0_i32_0 : i32, i32
  }
  func.func @transform_7(%arg0: i32) -> (i32, i32) {
    %c0_i32 = arith.constant 0 : i32
    %c0_i32_0 = arith.constant 0 : i32
    %c0_i32_1 = arith.constant 0 : i32
    return %c0_i32, %c0_i32_0 : i32, i32
  }
  func.func @transform_8(%arg0: i32) -> (i32, i32) {
    %c0_i32 = arith.constant 0 : i32
    %c0_i32_0 = arith.constant 0 : i32
    %c0_i32_1 = arith.constant 0 : i32
    return %c0_i32, %c0_i32_0 : i32, i32
  }
  func.func @transform_9(%arg0: i32) -> (i32, i32) {
    %c0_i32 = arith.constant 0 : i32
    %c0_i32_0 = arith.constant 0 : i32
    %c0_i32_1 = arith.constant 0 : i32
    return %c0_i32, %c0_i32_0 : i32, i32
  }
  func.func @transform_10(%arg0: i32) -> (i32, i32) {
    %c0_i32 = arith.constant 0 : i32
    %c0_i32_0 = arith.constant 0 : i32
    %c0_i32_1 = arith.constant 0 : i32
    return %c0_i32, %c0_i32_0 : i32, i32
  }
  func.func @transform_11(%arg0: i32) -> (i32, i32) {
    %c0_i32 = arith.constant 0 : i32
    %c0_i32_0 = arith.constant 0 : i32
    return %arg0, %c0_i32 : i32, i32
  }
}

</mosaic_0001>

<bundles_post_ra>
// kernel: tpu_custom_call.1
= control target key start
LH: loop header
LB: loop body
LE: loop exit
PB: predicated region body
PF: predicated region fallthrough
CT: control target
= control target key end

     0   :  { %16 = vsyncpa [#allocation3], 0  ;;  %s1166_s0 = inlined_call_operand.hbm [shape: f32[8,32], index: 0, kind: input, shape index: {}]   ;;  %s1167_s1 = inlined_call_operand.hbm [shape: f32[8,16], index: 1, kind: input, shape index: {}]   ;;  %s1168_s2 = inlined_call_operand.hbm [shape: bf16[32,128], index: 2, kind: input, shape index: {}]   ;;  %s1169_s3 = inlined_call_operand.vmem [shape: bf16[16,128], index: 3, kind: input, shape index: {}]   ;;  %s1170_s4 = inlined_call_operand.vmem [shape: f32[1,128], index: 4, kind: input, shape index: {}]   ;;  %s1171_s5 = inlined_call_operand.hbm [shape: bf16[128,128], index: 5, kind: input, shape index: {}]   ;;  %s1172_s6 = inlined_call_operand.vmem [shape: f32[1,128], index: 6, kind: input, shape index: {}]   ;;  %s1173_s7 = inlined_call_operand.hbm [shape: bf16[128,128], index: 7, kind: input, shape index: {}]   ;;  %s1174_s8 = inlined_call_operand.vmem [shape: f32[1,128], index: 8, kind: input, shape index: {}]   ;;  %s1175_s9 = inlined_call_operand.hbm [shape: bf16[128,128], index: 9, kind: input, shape index: {}]   ;;  %s1176_s10 = inlined_call_operand.vmem [shape: f32[1,128], index: 10, kind: input, shape index: {}]   ;;  %s1177_s11 = inlined_call_operand.hbm [shape: f32[8,128], index: 11, kind: output, shape index: {}]  }
   0x1   :  { %17 = vsyncpa [#allocation6], 0 }
   0x2   :  { %18 = vsyncpa [#allocation9], 0 }
   0x3   :  { %19 = vsyncpa [#allocation12], 0 }
   0x4   :  { %20 = vsyncpa [#allocation4], 0  ;;  %s947_s17 = smov [#allocation5]   ;;  %s783_s21 = scalar_lea.hbm %s1167_s1, 128 }
   0x5   :  { %s37_s18 = sshll.u32 %s947_s17, 4  ;;  %p784_p0 = scmp.ne.s32.totalorder %s1167_s1, %s783_s21  ;;  %s38_s18 = int_to_ptr.vmem [resolvable:$true] %s37_s18 }
   0x6   :  { %p787_p1 = scmp.lt.u32.totalorder %s783_s21, %s1167_s1 }
   0x8   :  { %p789_p2 = pnand %p787_p1, %p784_p0 }
   0xa   :  { %792 = shalt.err (!%p789_p2)
}
   0xb   :  { %s793_s26 = scalar_lea.vmem %s38_s18, 128  ;;  %p798_p4 = scmp.lt.s32.totalorder %s38_s18, %s38_s18 }
   0xc   :  { %p794_p3 = scmp.ne.s32.totalorder %s38_s18, %s793_s26  ;;  %p799_p5 = scmp.lt.s32.totalorder %s793_s26, %s793_s26 }
   0xe   :  { %p800_p6 = por %p799_p5, %p798_p4 }
  0x10   :  { %p801_p7 = pnand %p800_p6, %p794_p3 }
  0x12   :  { %804 = shalt.err (!%p801_p7)
}
  0x13   :  { %40 = dma.hbm_to_vmem [thread:$0]  %s1167_s1, 128, %s38_s18, [#allocation6]  }
  0x14   :  { %s948_s29 = smov [#allocation8]   ;;  %s949_s12 = smov [#allocation2]  }
  0x15   :  { %s62_s30 = sshll.u32 %s948_s29, 4  ;;  %s27_s13 = sshll.u32 %s949_s12, 4  ;;  %s63_s30 = int_to_ptr.vmem [resolvable:$true] %s62_s30  ;;  %s28_s13 = int_to_ptr.vmem [resolvable:$true] %s27_s13 }
  0x16   :  { %s805_s16 = scalar_lea.hbm %s1171_s5, 1024 }
  0x17   :  { %p806_p8 = scmp.ne.s32.totalorder %s1171_s5, %s805_s16  ;;  %p809_p9 = scmp.lt.u32.totalorder %s805_s16, %s1171_s5 }
  0x19   :  { %p811_p10 = pnand %p809_p9, %p806_p8 }
  0x1b   :  { %814 = shalt.err (!%p811_p10)
}
  0x1c   :  { %s815_s1 = scalar_lea.vmem %s63_s30, 1024  ;;  %p820_p12 = scmp.lt.s32.totalorder %s63_s30, %s63_s30 }
  0x1d   :  { %p816_p11 = scmp.ne.s32.totalorder %s63_s30, %s815_s1  ;;  %p821_p13 = scmp.lt.s32.totalorder %s815_s1, %s815_s1 }
  0x1f   :  { %p822_p0 = por %p821_p13, %p820_p12 }
  0x21   :  { %p823_p1 = pnand %p822_p0, %p816_p11 }
  0x23   :  { %826 = shalt.err (!%p823_p1)
}
  0x24   :  { %s950_s18 = smov 64   ;;  %s951_s22 = smov 4  }
  0x25   :  { %68 = dma.hbm_to_vmem [thread:$0]  %s1171_s5, 1024, %s63_s30, [#allocation9], %s950_s18, %s950_s18, %s951_s22  }
  0x26   :  { %s827_s27 = scalar_lea.hbm %s1166_s0, 128 }
  0x27   :  { %p828_p2 = scmp.ne.s32.totalorder %s1166_s0, %s827_s27  ;;  %p831_p3 = scmp.lt.u32.totalorder %s827_s27, %s1166_s0 }
  0x29   :  { %p833_p4 = pnand %p831_p3, %p828_p2 }
  0x2b   :  { %836 = shalt.err (!%p833_p4)
}
  0x2c   :  { %s837_s15 = scalar_lea.vmem %s28_s13, 128  ;;  %p842_p6 = scmp.lt.s32.totalorder %s28_s13, %s28_s13 }
  0x2d   :  { %p838_p5 = scmp.ne.s32.totalorder %s28_s13, %s837_s15  ;;  %p843_p7 = scmp.lt.s32.totalorder %s837_s15, %s837_s15 }
  0x2f   :  { %p844_p8 = por %p843_p7, %p842_p6 }
  0x31   :  { %p845_p9 = pnand %p844_p8, %p838_p5 }
  0x33   :  { %848 = shalt.err (!%p845_p9)
}
  0x34   :  { %30 = dma.hbm_to_vmem [thread:$0]  %s1166_s0, 128, %s28_s13, [#allocation3]  }
  0x35   :  { %s952_s16 = smov [#allocation7]   ;;  %s953_s19 = smov [#allocation10]  }
  0x36   :  { %s46_s17 = sshll.u32 %s952_s16, 4  ;;  %s76_s20 = sshll.u32 %s953_s19, 4  ;;  %s47_s17 = int_to_ptr.vmem [resolvable:$true] %s46_s17  ;;  %s77_s20 = int_to_ptr.vmem [resolvable:$true] %s76_s20 }
  0x37   :  { %s849_s23 = scalar_lea.hbm %s1168_s2, 256 }
  0x38   :  { %p850_p10 = scmp.ne.s32.totalorder %s1168_s2, %s849_s23  ;;  %p853_p11 = scmp.lt.u32.totalorder %s849_s23, %s1168_s2 }
  0x3a   :  { %p855_p12 = pnand %p853_p11, %p850_p10 }
  0x3c   :  { %858 = shalt.err (!%p855_p12)
}
  0x3d   :  { %s859_s0 = scalar_lea.vmem %s47_s17, 256  ;;  %p864_p0 = scmp.lt.s32.totalorder %s47_s17, %s47_s17 }
  0x3e   :  { %p860_p13 = scmp.ne.s32.totalorder %s47_s17, %s859_s0  ;;  %p865_p1 = scmp.lt.s32.totalorder %s859_s0, %s859_s0 }
  0x40   :  { %p866_p2 = por %p865_p1, %p864_p0 }
  0x42   :  { %p867_p3 = pnand %p866_p2, %p860_p13 }
  0x44   :  { %870 = shalt.err (!%p867_p3)
}
  0x45   :  { %52 = dma.hbm_to_vmem [thread:$0]  %s1168_s2, 256, %s47_s17, [#allocation6], %s950_s18, %s950_s18, %s951_s22  }
  0x46   :  { %s871_s14 = scalar_lea.hbm %s1173_s7, 1024 }
  0x47   :  { %p872_p4 = scmp.ne.s32.totalorder %s1173_s7, %s871_s14  ;;  %p875_p5 = scmp.lt.u32.totalorder %s871_s14, %s1173_s7 }
  0x49   :  { %p877_p6 = pnand %p875_p5, %p872_p4 }
  0x4b   :  { %880 = shalt.err (!%p877_p6)
}
  0x4c   :  { %s881_s19 = scalar_lea.vmem %s77_s20, 1024  ;;  %p886_p8 = scmp.lt.s32.totalorder %s77_s20, %s77_s20 }
  0x4d   :  { %p882_p7 = scmp.ne.s32.totalorder %s77_s20, %s881_s19  ;;  %p887_p9 = scmp.lt.s32.totalorder %s881_s19, %s881_s19 }
  0x4f   :  { %p888_p10 = por %p887_p9, %p886_p8 }
  0x51   :  { %p889_p11 = pnand %p888_p10, %p882_p7 }
  0x53   :  { %892 = shalt.err (!%p889_p11)
}
  0x54   :  { %82 = dma.hbm_to_vmem [thread:$0]  %s1173_s7, 1024, %s77_s20, [#allocation9], %s950_s18, %s950_s18, %s951_s22  }
  0x55   :  { %s954_s21 = smov [#allocation11]   ;;  %s893_s25 = scalar_lea.hbm %s1175_s9, 1024 }
  0x56   :  { %s90_s1 = sshll.u32 %s954_s21, 4  ;;  %p894_p12 = scmp.ne.s32.totalorder %s1175_s9, %s893_s25  ;;  %s91_s1 = int_to_ptr.vmem [resolvable:$true] %s90_s1 }
  0x57   :  { %p897_p13 = scmp.lt.u32.totalorder %s893_s25, %s1175_s9 }
  0x59   :  { %p899_p0 = pnand %p897_p13, %p894_p12 }
  0x5b   :  { %902 = shalt.err (!%p899_p0)
}
  0x5c   :  { %s903_s28 = scalar_lea.vmem %s91_s1, 1024  ;;  %p908_p2 = scmp.lt.s32.totalorder %s91_s1, %s91_s1 }
  0x5d   :  { %p904_p1 = scmp.ne.s32.totalorder %s91_s1, %s903_s28  ;;  %p909_p3 = scmp.lt.s32.totalorder %s903_s28, %s903_s28 }
  0x5f   :  { %p910_p4 = por %p909_p3, %p908_p2 }
  0x61   :  { %p911_p5 = pnand %p910_p4, %p904_p1 }
  0x63   :  { %914 = shalt.err (!%p911_p5)
}
  0x64   :  { %96 = dma.hbm_to_vmem [thread:$0]  %s1175_s9, 1024, %s91_s1, [#allocation12], %s950_s18, %s950_s18, %s951_s22  }
  0x65   :  { %937 = dma.done.wait [#allocation3], 128  }
  0x66   :  { %938 = vsyncadd [#allocation3], 4294967168 }
  0x67   :  { %939 = dma.done.wait [#allocation6], 384  }
  0x68   :  { %940 = vsyncadd [#allocation6], 4294966912 }
  0x69   :  { %941 = dma.done.wait [#allocation9], 2048  }
  0x6a   :  { %942 = vsyncadd [#allocation9], 4294965248 }
  0x6b   :  { %943 = dma.done.wait [#allocation12], 1024  }
  0x6c   :  { %944 = vsyncadd [#allocation12], 4294966272  ;;  %v955_v0 = vmov 0.0   ;;  %vm956_vm0 = vmmov 0   ;;  %v756_v1 = vld [vmem:[%s1169_s3] sm:$0xff]   ;;  %v124_v2 = vld [vmem:[#allocation5] sm:$0xff] }
  0x6d   :  { %671 = vmatprep.subr.bf16.mxu1 %v955_v0  ;;  %673 = vmatprep.mubr.msk.bf16.mxu1 %vm956_vm0, %v955_v0  ;;  %v125_v3 = vpack.c.bf16 %v124_v2, %v124_v2  ;;  %vm134_vm1 = vcmask 130048   ;;  %v757_v4 = vld [vmem:[#allocation7] sm:$0xff]   ;;  %v759_v5 = vld [vmem:[#allocation8] sm:$0xff]   ;;  %v758_v6 = vld [vmem:[#allocation7 + $0x8] sm:$0xff]   ;;  %vm190_vm2 = vcmask 261120   ;;  %s957_s5 = smov [#allocation13]  }
  0x6e   :  { %685 = vmatprep.subr.bf16.mxu0 %v955_v0  ;;  %701 = vmatprep.mubr.msk.bf16.mxu0 %vm956_vm0, %v955_v0  ;;  %v118_v7 = vld [vmem:[#allocation2] sm:$0xff]  ;;  %v760_v8 = vld [vmem:[#allocation8 + $0x8] sm:$0xff]   ;;  %v761_v10 = vld [vmem:[#allocation8 + $0x10] sm:$0xff]   ;;  %s594_s30 = sshll.u32 %s957_s5, 4  ;;  %s595_s30 = int_to_ptr.vmem [resolvable:$true] %s594_s30 }
  0x6f   :  { %672 = vmatpush3.bf16.msra.mxu1 %v756_v1  ;;  %686 = vmatpush3.bf16.msra.mxu0 %v759_v5  ;;  %v119_v9 = vpack.c.bf16 %v118_v7, %v118_v7  ;;  %v762_v11 = vld [vmem:[#allocation8 + $0x18] sm:$0xff]   ;;  %v763_v12 = vld [vmem:[#allocation8 + $0x20] sm:$0xff]   ;;  %v764_v13 = vld [vmem:[#allocation8 + $0x28] sm:$0xff]   ;;  %p920_p7 = scmp.lt.s32.totalorder %s595_s30, %s595_s30 }
  0x70   :  { %677 = vmatprep.subr.bf16.mxu1 %v955_v0  ;;  %687 = vmatprep.subr.bf16.mxu0 %v955_v0  ;;  %v765_v14 = vld [vmem:[#allocation8 + $0x30] sm:$0xff]   ;;  %v766_v15 = vld [vmem:[#allocation8 + $0x38] sm:$0xff]   ;;  %v767_v16 = vld [vmem:[#allocation10] sm:$0xff]  }
  0x71   :  { %v768_v17 = vld [vmem:[#allocation10 + $0x8] sm:$0xff]   ;;  %v769_v18 = vld [vmem:[#allocation10 + $0x10] sm:$0xff]   ;;  %v770_v19 = vld [vmem:[#allocation10 + $0x18] sm:$0xff]  }
  0x72   :  { %674 = vmatmul.mubr.msk.bf16.vlgmr.msra.gmra.mrb[0].mxu1 %vm134_vm1, %v125_v3  ;;  %v771_v20 = vld [vmem:[#allocation10 + $0x20] sm:$0xff]   ;;  %v772_v21 = vld [vmem:[#allocation10 + $0x28] sm:$0xff]   ;;  %v773_v36 = vld [vmem:[#allocation10 + $0x30] sm:$0xff]  }
  0x73   :  { %678 = vmatpush3.bf16.msra.mxu1 %v757_v4  ;;  %681 = vmatprep.mubr.msk.bf16.mxu1 %vm956_vm0, %v955_v0  ;;  %v611_v27 = vld [vmem:[%s1170_s4] ss:$0 sm:$0xff]  ;;  %v774_v37 = vld [vmem:[#allocation10 + $0x38] sm:$0xff]   ;;  %v776_v39 = vld [vmem:[#allocation11 + $0x8] sm:$0xff]  }
  0x74   :  { %679 = vmatprep.subr.bf16.mxu1 %v955_v0  ;;  %688 = vmatpush3.bf16.msra.mxu0 %v760_v8  ;;  %v775_v38 = vld [vmem:[#allocation11] sm:$0xff]   ;;  %v777_v40 = vld [vmem:[#allocation11 + $0x10] sm:$0xff]   ;;  %v778_v41 = vld [vmem:[#allocation11 + $0x18] sm:$0xff]  }
  0x75   :  { %689 = vmatprep.subr.bf16.mxu0 %v955_v0  ;;  %v779_v42 = vld [vmem:[#allocation11 + $0x20] sm:$0xff]   ;;  %v780_v43 = vld [vmem:[#allocation11 + $0x28] sm:$0xff]   ;;  %v781_v53 = vld [vmem:[#allocation11 + $0x30] sm:$0xff]  }
  0x76   :  { %v612_v44 = vld [vmem:[%s1172_s6] ss:$0 sm:$0xff]  ;;  %v782_v54 = vld [vmem:[#allocation11 + $0x38] sm:$0xff]  }
  0x77   :  { %680 = vmatpush3.bf16.msra.mxu1 %v758_v6  ;;  %v621_v55 = vld [vmem:[%s1174_s8] ss:$0 sm:$0xff]  ;;  %s915_s8 = scalar_lea.vmem %s595_s30, 128 }
  0x78   :  { %705 = vmatprep.subr.bf16.mxu1 %v955_v0  ;;  %690 = vmatpush3.bf16.msra.mxu0 %v761_v10  ;;  %p916_p6 = scmp.ne.s32.totalorder %s595_s30, %s915_s8  ;;  %p921_p8 = scmp.lt.s32.totalorder %s915_s8, %s915_s8 }
  0x79   :  { %691 = vmatprep.subr.bf16.mxu0 %v955_v0 }
  0x7a   :  { %682 = vmatmul.mubr.msk.bf16.vlgmr.msra.gmra.mrb[4].mxu1 %vm190_vm2, %v119_v9  ;;  %p922_p9 = por %p921_p8, %p920_p7 }
  0x7b   :  { %721 = vmatprep.mubr.msk.bf16.mxu1 %vm956_vm0, %v955_v0  ;;  %706 = vmatpush3.bf16.msra.mxu1 %v767_v16 }
  0x7c   :  { %692 = vmatpush3.bf16.msra.mxu0 %v762_v11  ;;  %707 = vmatprep.subr.bf16.mxu1 %v955_v0  ;;  %p923_p10 = pnand %p922_p9, %p916_p6 }
  0x7d   :  { %693 = vmatprep.subr.bf16.mxu0 %v955_v0 }
  0x7f   :  { %708 = vmatpush3.bf16.msra.mxu1 %v768_v17 }
  0x80   :  { %694 = vmatpush3.bf16.msra.mxu0 %v763_v12  ;;  %709 = vmatprep.subr.bf16.mxu1 %v955_v0 }
  0x81   :  { %695 = vmatprep.subr.bf16.mxu0 %v955_v0 }
  0x83   :  { %710 = vmatpush3.bf16.msra.mxu1 %v769_v18 }
  0x84   :  { %696 = vmatpush3.bf16.msra.mxu0 %v764_v13  ;;  %711 = vmatprep.subr.bf16.mxu1 %v955_v0 }
  0x85   :  { %697 = vmatprep.subr.bf16.mxu0 %v955_v0 }
  0x87   :  { %712 = vmatpush3.bf16.msra.mxu1 %v770_v19 }
  0x88   :  { %698 = vmatpush3.bf16.msra.mxu0 %v765_v14  ;;  %713 = vmatprep.subr.bf16.mxu1 %v955_v0 }
  0x89   :  { %699 = vmatprep.subr.bf16.mxu0 %v955_v0 }
  0x8b   :  { %714 = vmatpush3.bf16.msra.mxu1 %v771_v20 }
  0x8c   :  { %700 = vmatpush3.bf16.msra.mxu0 %v766_v15  ;;  %715 = vmatprep.subr.bf16.mxu1 %v955_v0 }
  0x8d   :  { %725 = vmatprep.subr.bf16.mxu0 %v955_v0 }
  0x8f   :  { %716 = vmatpush3.bf16.msra.mxu1 %v772_v21 }
  0x90   :  { %717 = vmatprep.subr.bf16.mxu1 %v955_v0 }
  0x93   :  { %718 = vmatpush3.bf16.msra.mxu1 %v773_v36 }
  0x94   :  { %719 = vmatprep.subr.bf16.mxu1 %v955_v0 }
  0x97   :  { %720 = vmatpush3.bf16.msra.mxu1 %v774_v37 }
 0x145   :  { %v172_v22 = vpop.f32.mrb[0].mxu1 }
 0x146   :  { %v675_v23 = vpop.f32.mrb[1].mxu1 }
 0x147   :  { %v175_v24 = vpop.f32.mrb[2].mxu1 }
 0x148   :  { %v676_v25 = vpop.f32.mrb[3].mxu1 }
 0x14d   :  { %v228_v26 = vpop.f32.mrb[4].mxu1 }
 0x14e   :  { %v229_v28 = vadd.f32 %v228_v26, %v172_v22  ;;  %v683_v29 = vpop.f32.mrb[5].mxu1 }
 0x14f   :  { %v231_v30 = vpop.f32.mrb[6].mxu1 }
 0x150   :  { %v241_v31 = vadd.f32 %v611_v27, %v229_v28  ;;  %v684_v32 = vpop.f32.mrb[7].mxu1 }
 0x152   :  { %v243_v33 = vmul.f32 0.2, %v241_v31  ;;  %vm242_vm3 = vcmp.ge.f32.partialorder %v241_v31, 0.0 }
 0x154   :  { %v244_v34 = vsel %vm242_vm3, %v241_v31, %v243_v33 }
 0x155   :  { %v245_v35 = vpack.c.bf16 %v244_v34, %v244_v34 }
 0x157   :  { %702 = vmatmul.mubr.bf16.vlgmr.msra.gmra.mrb[0].mxu0 %v245_v35 }
 0x158   :  { %741 = vmatprep.mubr.msk.bf16.mxu0 %vm956_vm0, %v955_v0  ;;  %726 = vmatpush3.bf16.msra.mxu0 %v775_v38 }
 0x159   :  { %727 = vmatprep.subr.bf16.mxu0 %v955_v0 }
 0x15c   :  { %728 = vmatpush3.bf16.msra.mxu0 %v776_v39 }
 0x15d   :  { %729 = vmatprep.subr.bf16.mxu0 %v955_v0 }
 0x160   :  { %730 = vmatpush3.bf16.msra.mxu0 %v777_v40 }
 0x161   :  { %731 = vmatprep.subr.bf16.mxu0 %v955_v0 }
 0x164   :  { %732 = vmatpush3.bf16.msra.mxu0 %v778_v41 }
 0x165   :  { %733 = vmatprep.subr.bf16.mxu0 %v955_v0 }
 0x168   :  { %734 = vmatpush3.bf16.msra.mxu0 %v779_v42 }
 0x169   :  { %735 = vmatprep.subr.bf16.mxu0 %v955_v0 }
 0x16c   :  { %736 = vmatpush3.bf16.msra.mxu0 %v780_v43 }
 0x16d   :  { %737 = vmatprep.subr.bf16.mxu0 %v955_v0 }
 0x170   :  { %738 = vmatpush3.bf16.msra.mxu0 %v781_v53 }
 0x171   :  { %739 = vmatprep.subr.bf16.mxu0 %v955_v0  ;;  %v630_v0 = vld [vmem:[%s1176_s10] ss:$0 sm:$0xff] }
 0x174   :  { %740 = vmatpush3.bf16.msra.mxu0 %v782_v54 }
 0x22a   :  { %v351_v45 = vpop.f32.mrb[0].mxu0 }
 0x22b   :  { %v352_v46 = vadd.f32 %v612_v44, %v351_v45  ;;  %v703_v47 = vpop.f32.mrb[1].mxu0 }
 0x22c   :  { %v354_v48 = vpop.f32.mrb[2].mxu0 }
 0x22d   :  { %vm357_vm4 = vcmp.ge.f32.partialorder %v352_v46, 0.0  ;;  %v358_v49 = vmul.f32 0.2, %v352_v46  ;;  %v704_v50 = vpop.f32.mrb[3].mxu0 }
 0x22f   :  { %v359_v51 = vsel %vm357_vm4, %v352_v46, %v358_v49 }
 0x230   :  { %v360_v52 = vpack.c.bf16 %v359_v51, %v359_v51 }
 0x232   :  { %722 = vmatmul.mubr.bf16.vlgmr.msra.gmra.mrb[8].mxu1 %v360_v52 }
 0x305   :  { %v466_v56 = vpop.f32.mrb[8].mxu1 }
 0x306   :  { %v467_v57 = vadd.f32 %v621_v55, %v466_v56  ;;  %v723_v58 = vpop.f32.mrb[9].mxu1 }
 0x307   :  { %v469_v59 = vpop.f32.mrb[10].mxu1 }
 0x308   :  { %vm472_vm5 = vcmp.ge.f32.partialorder %v467_v57, 0.0  ;;  %v473_v60 = vmul.f32 0.2, %v467_v57  ;;  %v724_v61 = vpop.f32.mrb[11].mxu1 }
 0x30a   :  { %v474_v62 = vsel %vm472_vm5, %v467_v57, %v473_v60 }
 0x30b   :  { %v475_v63 = vpack.c.bf16 %v474_v62, %v474_v62 }
 0x30d   :  { %742 = vmatmul.mubr.bf16.vlgmr.msra.gmra.mrb[4].mxu0 %v475_v63 }
 0x3e0   :  { %v581_v1 = vpop.f32.mrb[4].mxu0 }
 0x3e1   :  { %v582_v2 = vadd.f32 %v630_v0, %v581_v1  ;;  %v743_v3 = vpop.f32.mrb[5].mxu0 }
 0x3e2   :  { %v584_v4 = vpop.f32.mrb[6].mxu0 }
 0x3e3   :  { %587 = vst [vmem:[#allocation13] sm:$0xff] %v582_v2  ;;  %v744_v5 = vpop.f32.mrb[7].mxu0 }
 0x3e4   :  { %926 = shalt.err (!%p923_p10)
}
 0x3e5   :  { %s927_s10 = scalar_lea.hbm %s1177_s11, 128 }
 0x3e6   :  { %p928_p11 = scmp.ne.s32.totalorder %s1177_s11, %s927_s10  ;;  %p931_p12 = scmp.lt.u32.totalorder %s927_s10, %s1177_s11 }
 0x3e8   :  { %p933_p13 = pnand %p931_p12, %p928_p11 }
 0x3ea   :  { %936 = shalt.err (!%p933_p13)
}
 0x3eb   :  { %597 = dma.vmem_to_hbm [thread:$0]  %s595_s30, 128, %s1177_s11, [#allocation4]  }
 0x3ec   :  { %945 = dma.done.wait [#allocation4], 128  }
 0x3ed   :  { %946 = vsyncadd [#allocation4], 4294967168 }
 0x3ee   :  { %601 = vsyncpa [#allocation3], 1 }
 0x3ef   :  { %602 = vsyncpa [#allocation6], 1 }
 0x3f0   :  { %603 = vsyncpa [#allocation9], 1 }
 0x3f1   :  { %604 = vsyncpa [#allocation12], 1 }
 0x3f2   :  { %605 = vsyncpa [#allocation4], 1 }

</bundles_post_ra>
